<compile_context>
chip_gen: v5e
topology: v5e:2x2
jax: 0.10.0
libtpu: 0.0.40
codegen_flags: <defaults>
</compile_context>

<pallas_src>
import jax
import jax.numpy as jnp
from jax.experimental import pallas as pl
from jax.experimental.pallas import tpu as pltpu


def _round_up(x: int, m: int) -> int:
    return ((x + m - 1) // m) * m


def _tpu_info():
    try:
        return pltpu.get_tpu_info()
    except Exception:
        return None


def _vmem_capacity_bytes() -> int:
    info = _tpu_info()
    cap = getattr(info, "vmem_capacity_bytes", None) if info is not None else None
    return int(cap) if cap else (128 << 20)


def _num_tensorcores() -> int:
    info = _tpu_info()
    if info is not None:
        for attr in ("tensorcores_per_chip", "num_tensorcores",
                     "tensorcore_count", "cores_per_chip"):
            v = getattr(info, attr, None)
            if isinstance(v, int) and v > 0:
                return v
    # Conservative fallback: assume 1 TC (no forced grid splitting).
    return 1


def _fcn_kernel(x_ref, w1_ref, b1_ref, w2_ref, b2_ref, o_ref):
    # x: (tm, D) f32|bf16 | w1: (D, D) bf16 | b1: (1, D) f32
    # w2: (D, Lo) bf16    | b2: (1, Lo) f32 | o: (tm, Lo) f32|bf16
    x = x_ref[...]
    if x.dtype != jnp.bfloat16:
        x = x.astype(jnp.bfloat16)                    # cast at the MXU input
    h = jnp.dot(x, w1_ref[...], preferred_element_type=jnp.float32)
    h = jnp.maximum(h + b1_ref[...], 0.0)             # bias + ReLU in f32
    out = jnp.dot(h.astype(jnp.bfloat16), w2_ref[...],
                  preferred_element_type=jnp.float32) + b2_ref[...]
    o_ref[...] = out.astype(o_ref.dtype)


def _pick_tile_m(M, D, L_out, x_bytes, out_bytes, num_cores, budget):
    # Per-row live VMEM: double-buffered x and out tiles, plus the in-kernel
    # intermediates (f32 h + bf16 copies of x and h ~= 8*D bytes per row).
    weight_bytes = D * D * 2 + D * L_out * 2 + (D + L_out) * 4   # single-buffered
    per_row = 2 * D * x_bytes + 2 * L_out * out_bytes + 8 * D
    avail = max(budget - weight_bytes, 8 * per_row)
    max_rows = max(8, (avail // per_row) // 8 * 8)
    tile = min(1024, _round_up(M, 8), max_rows)
    # Only force >=2 (and even) grid steps when the chip actually has 2 TCs;
    # splitting on a single-TC chip is pure pipeline overhead.
    if num_cores >= 2 and M > 8:
        steps = pl.cdiv(M, tile)
        if steps == 1 or steps % 2:
            steps = 2 if steps == 1 else steps + 1
            tile = max(8, min(tile, _round_up(pl.cdiv(M, steps), 8)))
    return max(8, tile)


def fcn_forward(elm_agg_emb, w1, b1, w2, b2, *, tile_m=None, out_dtype=jnp.float32):
    """elm_agg_emb: (S, B, D) f32 or bf16; w1 (D,D), b1 (D,), w2 (D,L), b2 (L,).

    Returns (B, S, L) `out_dtype` — same as FCN(d_model, label_num).forward.
    Note: MXU inputs are bf16 (intentional precision contract); accumulation,
    bias and ReLU are f32.
    """
    S, B, D = elm_agg_emb.shape
    L = w2.shape[1]
    M = S * B

    # Lane-dense output only when it is (nearly) free: L % 128 == 0 keeps L,
    # L > 128 pads to the next 128 multiple; tiny L (<=128) stays un-padded
    # (masked stores, but 128/L x less output HBM traffic).
    if L % 128 == 0 or L < 128:
        L_out = L
    else:
        L_out = _round_up(L, 128)

    x_bytes = 2 if elm_agg_emb.dtype == jnp.bfloat16 else 4
    out_bytes = jnp.dtype(out_dtype).itemsize

    cap = _vmem_capacity_bytes()
    num_cores = _num_tensorcores()

    if tile_m is None:
        tile_m = _pick_tile_m(M, D, L_out, x_bytes, out_bytes, num_cores,
                              budget=int(0.70 * cap))
    tile_m = max(8, _round_up(tile_m, 8))

    # Native (S*B, D) row order — reshape is free; no activation transpose, no pad.
    x2d = elm_agg_emb.reshape(M, D)

    # bf16 weights for the MXU; pad W2/b2 columns only when L_out > L.
    w1b = w1.astype(jnp.bfloat16)
    w2b = (w2 if L_out == L else jnp.pad(w2, ((0, 0), (0, L_out - L)))).astype(jnp.bfloat16)
    b1_2d = b1.reshape(1, D).astype(jnp.float32)
    b2p = b2 if L_out == L else jnp.pad(b2, (0, L_out - L))
    b2_2d = b2p.reshape(1, L_out).astype(jnp.float32)

    grid_m = pl.cdiv(M, tile_m)   # ragged last block: reads padded, OOB writes dropped

    # Chip-aware scoped-VMEM budget (includes intermediates + single-buffered weights).
    weight_bytes = D * D * 2 + D * L_out * 2 + (D + L_out) * 4
    vmem_need = (2 * tile_m * D * x_bytes + 2 * tile_m * L_out * out_bytes
                 + weight_bytes + 8 * tile_m * D)
    vmem_limit = int(min(0.9 * cap, max(16 << 20, 1.3 * vmem_need + (2 << 20))))

    cost = pl.CostEstimate(
        flops=2 * M * D * (D + L_out),
        transcendentals=0,
        bytes_accessed=M * D * x_bytes + weight_bytes + M * L_out * out_bytes,
    )

    def _call(single_buffer_weights: bool):
        const_kw = {"pipeline_mode": pl.Buffered(1)} if single_buffer_weights else {}
        in_specs = [
            pl.BlockSpec((tile_m, D), lambda i: (i, 0)),               # activation rows
            pl.BlockSpec((D, D), lambda i: (0, 0), **const_kw),        # W1 (resident)
            pl.BlockSpec((1, D), lambda i: (0, 0), **const_kw),        # b1
            pl.BlockSpec((D, L_out), lambda i: (0, 0), **const_kw),    # W2 (resident)
            pl.BlockSpec((1, L_out), lambda i: (0, 0), **const_kw),    # b2
        ]
        return pl.pallas_call(
            _fcn_kernel,
            out_shape=jax.ShapeDtypeStruct((M, L_out), out_dtype),
            grid_spec=pltpu.PrefetchScalarGridSpec(
                num_scalar_prefetch=0,
                grid=(grid_m,),
                in_specs=in_specs,
                out_specs=pl.BlockSpec((tile_m, L_out), lambda i: (i, 0)),
            ),
            compiler_params=pltpu.CompilerParams(
                dimension_semantics=("parallel",),
                vmem_limit_bytes=vmem_limit,
            ),
            cost_estimate=cost,
        )(x2d, w1b, b1_2d, w2b, b2_2d)

    try:
        out_p = _call(single_buffer_weights=True)
    except Exception:
        # Fallback for Pallas versions without BlockSpec pipeline_mode support.
        out_p = _call(single_buffer_weights=False)

    # Small glue: drop column padding (if any) and apply the module's permute on
    # the (S, B, L) output (L << D, far cheaper than transposing the input slab).
    out = out_p[:, :L].reshape(S, B, L)
    return jnp.transpose(out, (1, 0, 2))


def init_params(key, d_model, label_num):
    """Deterministic synthetic init of Linearx2 weights.

    Linearx2(d_model, label_num) = Linear(d_model, d_model) -> ReLU
                                   -> Linear(d_model, label_num).
    Weights stored already-transposed as (in, out) for x @ W.
    """
    k1, k2, k3, k4 = jax.random.split(key, 4)
    s1 = 1.0 / jnp.sqrt(d_model)
    w1 = jax.random.uniform(k1, (d_model, d_model), jnp.float32, -s1, s1)
    b1 = jax.random.uniform(k2, (d_model,), jnp.float32, -s1, s1)
    w2 = jax.random.uniform(k3, (d_model, label_num), jnp.float32, -s1, s1)
    b2 = jax.random.uniform(k4, (label_num,), jnp.float32, -s1, s1)
    return w1, b1, w2, b2


if __name__ == "__main__":
    # Small shapes implied by forward: elm_agg_emb is (seq, batch, d_model).
    S, B, D, L = 8, 2, 32, 16

    key = jax.random.PRNGKey(0)
    kx, kp = jax.random.split(key)
    elm_agg_emb = jax.random.normal(kx, (S, B, D), jnp.float32)
    w1, b1, w2, b2 = init_params(kp, D, L)

    out = fcn_forward(elm_agg_emb, w1, b1, w2, b2)
    out = jax.block_until_ready(out)
    assert out.shape == (B, S, L)

    # Reference 1: same math with matching bf16 MXU inputs (tight tolerance).
    x_bsd = jnp.transpose(elm_agg_emb, (1, 0, 2))
    h_bf = jnp.einsum("bsd,de->bse", x_bsd.astype(jnp.bfloat16),
                      w1.astype(jnp.bfloat16),
                      preferred_element_type=jnp.float32) + b1
    h_bf = jnp.maximum(h_bf, 0.0)
    ref_bf = jnp.einsum("bse,el->bsl", h_bf.astype(jnp.bfloat16),
                        w2.astype(jnp.bfloat16),
                        preferred_element_type=jnp.float32) + b2
    assert jnp.allclose(out, ref_bf, atol=1e-2, rtol=1e-2)

    # Reference 2: pure f32 PyTorch semantics (loose tolerance for bf16 MXU path).
    h_f32 = jnp.maximum(x_bsd @ w1 + b1, 0.0)
    ref_f32 = h_f32 @ w2 + b2
    assert jnp.allclose(out, ref_f32, atol=6e-2, rtol=6e-2)

    # bf16-activation path (in production the cast lives in the upstream producer,
    # halving the dominant x HBM stream; here it is applied only for the test).
    out_bf16_in = fcn_forward(elm_agg_emb.astype(jnp.bfloat16), w1, b1, w2, b2)
    out_bf16_in = jax.block_until_ready(out_bf16_in)
    assert out_bf16_in.shape == (B, S, L)
    assert jnp.allclose(out_bf16_in, ref_bf, atol=3e-2, rtol=3e-2)

    print("KERNEL_OK")
</pallas_src>

<mosaic_0001>
module attributes {stable_mosaic.version = 11 : i64} {
  func.func @_fcn_kernel(%arg0: i32, %arg1: memref<16x32xf32, #tpu.memory_space<vmem>>, %arg2: memref<32x32xbf16, #tpu.memory_space<vmem>>, %arg3: memref<1x32xf32, #tpu.memory_space<vmem>>, %arg4: memref<32x16xbf16, #tpu.memory_space<vmem>>, %arg5: memref<1x16xf32, #tpu.memory_space<vmem>>, %arg6: memref<16x16xf32, #tpu.memory_space<vmem>>) attributes {dimension_semantics = [#tpu.dimension_semantics<parallel>], iteration_bounds = array<i64: 1>, scalar_prefetch = 0 : i64, scratch_operands = 0 : i64, tpu.core_type = #tpu.core_type<tc>, window_params = [{transform_indices = @transform_0, window_bounds = array<i64: 16, 32>}, {pipeline_mode = #tpu.pipeline_mode<synchronous>, transform_indices = @transform_1, window_bounds = array<i64: 32, 32>}, {pipeline_mode = #tpu.pipeline_mode<synchronous>, transform_indices = @transform_2, window_bounds = array<i64: 1, 32>}, {pipeline_mode = #tpu.pipeline_mode<synchronous>, transform_indices = @transform_3, window_bounds = array<i64: 32, 16>}, {pipeline_mode = #tpu.pipeline_mode<synchronous>, transform_indices = @transform_4, window_bounds = array<i64: 1, 16>}, {transform_indices = @transform_5, window_bounds = array<i64: 16, 16>}]} {
    %c0 = arith.constant 0 : index
    %c0_0 = arith.constant 0 : index
    %0 = vector.load %arg1[%c0, %c0_0] : memref<16x32xf32, #tpu.memory_space<vmem>>, vector<16x32xf32>
    %1 = arith.truncf %0 : vector<16x32xf32> to vector<16x32xbf16>
    %c0_1 = arith.constant 0 : index
    %c0_2 = arith.constant 0 : index
    %2 = vector.load %arg2[%c0_1, %c0_2] : memref<32x32xbf16, #tpu.memory_space<vmem>>, vector<32x32xbf16>
    %cst = arith.constant dense<0.000000e+00> : vector<16x32xf32>
    %3 = tpu.matmul %1, %2, %cst {dimension_numbers = #tpu.dot_dimension_numbers<[1], [0], [0], [1], [0, 0, 1, 1], [], []>} : vector<16x32xbf16>, vector<32x32xbf16>, vector<16x32xf32> -> vector<16x32xf32>
    %c0_3 = arith.constant 0 : index
    %c0_4 = arith.constant 0 : index
    %4 = vector.load %arg3[%c0_3, %c0_4] : memref<1x32xf32, #tpu.memory_space<vmem>>, vector<1x32xf32>
    %5 = vector.broadcast %4 : vector<1x32xf32> to vector<16x32xf32>
    %6 = arith.addf %3, %5 : vector<16x32xf32>
    %cst_5 = arith.constant 0.000000e+00 : f32
    %7 = vector.broadcast %cst_5 : f32 to vector<16x32xf32>
    %8 = arith.maximumf %6, %7 : vector<16x32xf32>
    %9 = arith.truncf %8 : vector<16x32xf32> to vector<16x32xbf16>
    %c0_6 = arith.constant 0 : index
    %c0_7 = arith.constant 0 : index
    %10 = vector.load %arg4[%c0_6, %c0_7] : memref<32x16xbf16, #tpu.memory_space<vmem>>, vector<32x16xbf16>
    %cst_8 = arith.constant dense<0.000000e+00> : vector<16x16xf32>
    %11 = tpu.matmul %9, %10, %cst_8 {dimension_numbers = #tpu.dot_dimension_numbers<[1], [0], [0], [1], [0, 0, 1, 1], [], []>} : vector<16x32xbf16>, vector<32x16xbf16>, vector<16x16xf32> -> vector<16x16xf32>
    %c0_9 = arith.constant 0 : index
    %c0_10 = arith.constant 0 : index
    %12 = vector.load %arg5[%c0_9, %c0_10] : memref<1x16xf32, #tpu.memory_space<vmem>>, vector<1x16xf32>
    %13 = vector.broadcast %12 : vector<1x16xf32> to vector<16x16xf32>
    %14 = arith.addf %11, %13 : vector<16x16xf32>
    %c0_11 = arith.constant 0 : index
    %c0_12 = arith.constant 0 : index
    %15 = vector.load %arg6[%c0_11, %c0_12] : memref<16x16xf32, #tpu.memory_space<vmem>>, vector<16x16xf32>
    tpu.vector_store %arg6[%c0_11, %c0_12], %14 {strides = array<i32>} : memref<16x16xf32, #tpu.memory_space<vmem>>, vector<16x16xf32>,
    return
  }
  func.func @transform_0(%arg0: i32) -> (i32, i32) {
    %c0_i32 = arith.constant 0 : i32
    %c0_i32_0 = arith.constant 0 : i32
    return %arg0, %c0_i32 : i32, i32
  }
  func.func @transform_1(%arg0: i32) -> (i32, i32) {
    %c0_i32 = arith.constant 0 : i32
    %c0_i32_0 = arith.constant 0 : i32
    %c0_i32_1 = arith.constant 0 : i32
    return %c0_i32, %c0_i32_0 : i32, i32
  }
  func.func @transform_2(%arg0: i32) -> (i32, i32) {
    %c0_i32 = arith.constant 0 : i32
    %c0_i32_0 = arith.constant 0 : i32
    %c0_i32_1 = arith.constant 0 : i32
    return %c0_i32, %c0_i32_0 : i32, i32
  }
  func.func @transform_3(%arg0: i32) -> (i32, i32) {
    %c0_i32 = arith.constant 0 : i32
    %c0_i32_0 = arith.constant 0 : i32
    %c0_i32_1 = arith.constant 0 : i32
    return %c0_i32, %c0_i32_0 : i32, i32
  }
  func.func @transform_4(%arg0: i32) -> (i32, i32) {
    %c0_i32 = arith.constant 0 : i32
    %c0_i32_0 = arith.constant 0 : i32
    %c0_i32_1 = arith.constant 0 : i32
    return %c0_i32, %c0_i32_0 : i32, i32
  }
  func.func @transform_5(%arg0: i32) -> (i32, i32) {
    %c0_i32 = arith.constant 0 : i32
    %c0_i32_0 = arith.constant 0 : i32
    return %arg0, %c0_i32 : i32, i32
  }
}

module attributes {stable_mosaic.version = 11 : i64} {
  func.func @_fcn_kernel(%arg0: i32, %arg1: memref<16x32xf32, #tpu.memory_space<vmem>>, %arg2: memref<32x32xbf16, #tpu.memory_space<vmem>>, %arg3: memref<1x32xf32, #tpu.memory_space<vmem>>, %arg4: memref<32x16xbf16, #tpu.memory_space<vmem>>, %arg5: memref<1x16xf32, #tpu.memory_space<vmem>>, %arg6: memref<16x16xf32, #tpu.memory_space<vmem>>) attributes {dimension_semantics = [#tpu.dimension_semantics<parallel>], iteration_bounds = array<i64: 1>, scalar_prefetch = 0 : i64, scratch_operands = 0 : i64, tpu.core_type = #tpu.core_type<tc>, window_params = [{transform_indices = @transform_0, window_bounds = array<i64: 16, 32>}, {pipeline_mode = #tpu.pipeline_mode<synchronous>, transform_indices = @transform_1, window_bounds = array<i64: 32, 32>}, {pipeline_mode = #tpu.pipeline_mode<synchronous>, transform_indices = @transform_2, window_bounds = array<i64: 1, 32>}, {pipeline_mode = #tpu.pipeline_mode<synchronous>, transform_indices = @transform_3, window_bounds = array<i64: 32, 16>}, {pipeline_mode = #tpu.pipeline_mode<synchronous>, transform_indices = @transform_4, window_bounds = array<i64: 1, 16>}, {transform_indices = @transform_5, window_bounds = array<i64: 16, 16>}]} {
    %c0 = arith.constant 0 : index
    %c0_0 = arith.constant 0 : index
    %0 = vector.load %arg1[%c0, %c0_0] : memref<16x32xf32, #tpu.memory_space<vmem>>, vector<16x32xf32>
    %1 = arith.truncf %0 : vector<16x32xf32> to vector<16x32xbf16>
    %c0_1 = arith.constant 0 : index
    %c0_2 = arith.constant 0 : index
    %2 = vector.load %arg2[%c0_1, %c0_2] : memref<32x32xbf16, #tpu.memory_space<vmem>>, vector<32x32xbf16>
    %cst = arith.constant dense<0.000000e+00> : vector<16x32xf32>
    %3 = tpu.matmul %1, %2, %cst {dimension_numbers = #tpu.dot_dimension_numbers<[1], [0], [0], [1], [0, 0, 1, 1], [], []>} : vector<16x32xbf16>, vector<32x32xbf16>, vector<16x32xf32> -> vector<16x32xf32>
    %c0_3 = arith.constant 0 : index
    %c0_4 = arith.constant 0 : index
    %4 = vector.load %arg3[%c0_3, %c0_4] : memref<1x32xf32, #tpu.memory_space<vmem>>, vector<1x32xf32>
    %5 = vector.broadcast %4 : vector<1x32xf32> to vector<16x32xf32>
    %6 = arith.addf %3, %5 : vector<16x32xf32>
    %cst_5 = arith.constant 0.000000e+00 : f32
    %7 = vector.broadcast %cst_5 : f32 to vector<16x32xf32>
    %8 = arith.maximumf %6, %7 : vector<16x32xf32>
    %9 = arith.truncf %8 : vector<16x32xf32> to vector<16x32xbf16>
    %c0_6 = arith.constant 0 : index
    %c0_7 = arith.constant 0 : index
    %10 = vector.load %arg4[%c0_6, %c0_7] : memref<32x16xbf16, #tpu.memory_space<vmem>>, vector<32x16xbf16>
    %cst_8 = arith.constant dense<0.000000e+00> : vector<16x16xf32>
    %11 = tpu.matmul %9, %10, %cst_8 {dimension_numbers = #tpu.dot_dimension_numbers<[1], [0], [0], [1], [0, 0, 1, 1], [], []>} : vector<16x32xbf16>, vector<32x16xbf16>, vector<16x16xf32> -> vector<16x16xf32>
    %c0_9 = arith.constant 0 : index
    %c0_10 = arith.constant 0 : index
    %12 = vector.load %arg5[%c0_9, %c0_10] : memref<1x16xf32, #tpu.memory_space<vmem>>, vector<1x16xf32>
    %13 = vector.broadcast %12 : vector<1x16xf32> to vector<16x16xf32>
    %14 = arith.addf %11, %13 : vector<16x16xf32>
    %c0_11 = arith.constant 0 : index
    %c0_12 = arith.constant 0 : index
    %15 = vector.load %arg6[%c0_11, %c0_12] : memref<16x16xf32, #tpu.memory_space<vmem>>, vector<16x16xf32>
    tpu.vector_store %arg6[%c0_11, %c0_12], %14 {strides = array<i32>} : memref<16x16xf32, #tpu.memory_space<vmem>>, vector<16x16xf32>,
    return
  }
  func.func @transform_0(%arg0: i32) -> (i32, i32) {
    %c0_i32 = arith.constant 0 : i32
    %c0_i32_0 = arith.constant 0 : i32
    return %arg0, %c0_i32 : i32, i32
  }
  func.func @transform_1(%arg0: i32) -> (i32, i32) {
    %c0_i32 = arith.constant 0 : i32
    %c0_i32_0 = arith.constant 0 : i32
    %c0_i32_1 = arith.constant 0 : i32
    return %c0_i32, %c0_i32_0 : i32, i32
  }
  func.func @transform_2(%arg0: i32) -> (i32, i32) {
    %c0_i32 = arith.constant 0 : i32
    %c0_i32_0 = arith.constant 0 : i32
    %c0_i32_1 = arith.constant 0 : i32
    return %c0_i32, %c0_i32_0 : i32, i32
  }
  func.func @transform_3(%arg0: i32) -> (i32, i32) {
    %c0_i32 = arith.constant 0 : i32
    %c0_i32_0 = arith.constant 0 : i32
    %c0_i32_1 = arith.constant 0 : i32
    return %c0_i32, %c0_i32_0 : i32, i32
  }
  func.func @transform_4(%arg0: i32) -> (i32, i32) {
    %c0_i32 = arith.constant 0 : i32
    %c0_i32_0 = arith.constant 0 : i32
    %c0_i32_1 = arith.constant 0 : i32
    return %c0_i32, %c0_i32_0 : i32, i32
  }
  func.func @transform_5(%arg0: i32) -> (i32, i32) {
    %c0_i32 = arith.constant 0 : i32
    %c0_i32_0 = arith.constant 0 : i32
    return %arg0, %c0_i32 : i32, i32
  }
}

</mosaic_0001>

<bundles_post_ra>
// kernel: tpu_custom_call.1
= control target key start
LH: loop header
LB: loop body
LE: loop exit
PB: predicated region body
PF: predicated region fallthrough
CT: control target
= control target key end

     0   :  { %10 = vsyncpa [#allocation3], 0  ;;  %s283_s0 = inlined_call_operand.vmem [shape: f32[16,32], index: 0, kind: input, shape index: {}]   ;;  %s284_s1 = inlined_call_operand.hbm [shape: bf16[32,32], index: 1, kind: input, shape index: {}]   ;;  %s285_s2 = inlined_call_operand.vmem [shape: f32[1,32], index: 2, kind: input, shape index: {}]   ;;  %s286_s3 = inlined_call_operand.vmem [shape: bf16[32,16], index: 3, kind: input, shape index: {}]   ;;  %s287_s4 = inlined_call_operand.vmem [shape: f32[1,16], index: 4, kind: input, shape index: {}]   ;;  %s288_s5 = inlined_call_operand.hbm [shape: f32[16,16], index: 5, kind: output, shape index: {}]  }
   0x1   :  { %11 = vsyncpa [#allocation4], 0  ;;  %s18_s20 = sshll.u32 %s284_s1, 4  ;;  %s223_s21 = smov [#allocation2]   ;;  %s19_s20 = int_to_ptr.hbm [resolvable:$true] %s18_s20 }
   0x2   :  { %s20_s22 = sshll.u32 %s223_s21, 4  ;;  %s224_s23 = smov 64   ;;  %s21_s22 = int_to_ptr.vmem [resolvable:$true] %s20_s22 }
   0x3   :  { %s225_s24 = smov 4  }
   0x4   :  { %26 = dma.hbm_to_vmem [thread:$0]  %s19_s20, 256, %s21_s22, [#allocation3], %s224_s23, %s224_s23, %s225_s24  }
   0x5   :  { %219 = dma.done.wait [#allocation3], 256  }
   0x6   :  { %220 = vsyncadd [#allocation3], 4294967040  ;;  %v160_v0 = vld [vmem:[#allocation2 + $0x8] sm:$0xff]  ;;  %v159_v1 = vld [vmem:[#allocation2] sm:$0xff]  ;;  %vm61_vm0 = vcmask 261120   ;;  %vm119_vm1 = vcmask 130048  }
   0x7   :  { %71 = vmatpush.bf16.msra.mxu0 %v160_v0  ;;  %v38_v2 = vld [vmem:[%s283_s0] sm:$0xff]  ;;  %v39_v3 = vld [vmem:[%s283_s0 + $0x8] sm:$0xff]  ;;  %s227_s13 = smov 128   ;;  %s228_s14 = smov 8  }
   0x8   :  { %v40_v4 = vpack.c.bf16 %v39_v3, %v38_v2  ;;  %v162_v5 = vld [vmem:[%s286_s3 + $0x8] sm:$0xff]  ;;  %v161_v6 = vld [vmem:[%s286_s3] sm:$0xff]  ;;  %s226_s3 = smov [#allocation5]  }
   0x9   :  { %111 = vmatpush.bf16.msra.mxu1 %v162_v5  ;;  %v169_v8 = vld [vmem:[%s285_s2] ss:$0 sm:$0xff]  ;;  %s126_s10 = sshll.u32 %s226_s3, 4  ;;  %s128_s2 = sshll.u32 %s288_s5, 4  ;;  %s127_s10 = int_to_ptr.vmem [resolvable:$true] %s126_s10  ;;  %s129_s2 = int_to_ptr.hbm [resolvable:$true] %s128_s2 }
   0xa   :  { %v170_v15 = vld [vmem:[%s287_s4] ss:$0 sm:$0xff] }
   0xb   :  { %72 = vmatpush.bf16.msra.mxu0 %v159_v1 }
   0xd   :  { %112 = vmatpush.bf16.msra.mxu1 %v161_v6 }
   0xe   :  { %149 = vmatmul.msk.bf16.vlgmr.msra.gmra.mxu0 %vm61_vm0, %v40_v4 }
  0x8b   :  { %v74_v7 = vpop.f32.mrf.mxu0 }
  0x8c   :  { %v75_v9 = vadd.f32 %v169_v8, %v74_v7 }
  0x8e   :  { %v79_v12 = vmax.f32 %v75_v9, 0.0 }
  0x93   :  { %v76_v10 = vpop.f32.mrf.mxu0 }
  0x94   :  { %v77_v11 = vadd.f32 %v169_v8, %v76_v10 }
  0x96   :  { %v80_v13 = vmax.f32 %v77_v11, 0.0 }
  0x98   :  { %v81_v14 = vpack.c.bf16 %v80_v13, %v79_v12 }
  0x9a   :  { %158 = vmatmul.msk.bf16.vlgmr.msra.gmra.mxu1 %vm61_vm0, %v81_v14 }
 0x117   :  { %v114_v16 = vpop.f32.mrf.mxu1 }
 0x118   :  { %v115_v17 = vadd.f32 %v170_v15, %v114_v16 }
 0x11a   :  { %120 = vst.msk [vmem:[#allocation5] sm:$0xff] %vm119_vm1, %v115_v17 }
 0x11f   :  { %v116_v18 = vpop.f32.mrf.mxu1 }
 0x120   :  { %v117_v19 = vadd.f32 %v170_v15, %v116_v18 }
 0x122   :  { %121 = vst.msk [vmem:[#allocation5 + $0x8] sm:$0xff] %vm119_vm1, %v117_v19 }
 0x123   :  { %134 = dma.vmem_to_hbm [thread:$0]  %s127_s10, 256, %s129_s2, [#allocation4], %s227_s13, %s227_s13, %s228_s14  }
 0x124   :  { %221 = dma.done.wait [#allocation4], 256  }
 0x125   :  { %222 = vsyncadd [#allocation4], 4294967040 }
 0x126   :  { %139 = vsyncpa [#allocation3], 1 }
 0x127   :  { %140 = vsyncpa [#allocation4], 1 }

// kernel: tpu_custom_call.1
= control target key start
LH: loop header
LB: loop body
LE: loop exit
PB: predicated region body
PF: predicated region fallthrough
CT: control target
= control target key end

     0   :  { %10 = vsyncpa [#allocation3], 0  ;;  %s283_s0 = inlined_call_operand.vmem [shape: f32[16,32], index: 0, kind: input, shape index: {}]   ;;  %s284_s1 = inlined_call_operand.hbm [shape: bf16[32,32], index: 1, kind: input, shape index: {}]   ;;  %s285_s2 = inlined_call_operand.vmem [shape: f32[1,32], index: 2, kind: input, shape index: {}]   ;;  %s286_s3 = inlined_call_operand.vmem [shape: bf16[32,16], index: 3, kind: input, shape index: {}]   ;;  %s287_s4 = inlined_call_operand.vmem [shape: f32[1,16], index: 4, kind: input, shape index: {}]   ;;  %s288_s5 = inlined_call_operand.hbm [shape: f32[16,16], index: 5, kind: output, shape index: {}]  }
   0x1   :  { %11 = vsyncpa [#allocation4], 0  ;;  %s18_s20 = sshll.u32 %s284_s1, 4  ;;  %s223_s21 = smov [#allocation2]   ;;  %s19_s20 = int_to_ptr.hbm [resolvable:$true] %s18_s20 }
   0x2   :  { %s20_s22 = sshll.u32 %s223_s21, 4  ;;  %s224_s23 = smov 64   ;;  %s21_s22 = int_to_ptr.vmem [resolvable:$true] %s20_s22 }
   0x3   :  { %s225_s24 = smov 4  }
   0x4   :  { %26 = dma.hbm_to_vmem [thread:$0]  %s19_s20, 256, %s21_s22, [#allocation3], %s224_s23, %s224_s23, %s225_s24  }
   0x5   :  { %219 = dma.done.wait [#allocation3], 256  }
   0x6   :  { %220 = vsyncadd [#allocation3], 4294967040  ;;  %v160_v0 = vld [vmem:[#allocation2 + $0x8] sm:$0xff]  ;;  %v159_v1 = vld [vmem:[#allocation2] sm:$0xff]  ;;  %vm61_vm0 = vcmask 261120   ;;  %vm119_vm1 = vcmask 130048  }
   0x7   :  { %71 = vmatpush.bf16.msra.mxu0 %v160_v0  ;;  %v38_v2 = vld [vmem:[%s283_s0] sm:$0xff]  ;;  %v39_v3 = vld [vmem:[%s283_s0 + $0x8] sm:$0xff]  ;;  %s227_s13 = smov 128   ;;  %s228_s14 = smov 8  }
   0x8   :  { %v40_v4 = vpack.c.bf16 %v39_v3, %v38_v2  ;;  %v162_v5 = vld [vmem:[%s286_s3 + $0x8] sm:$0xff]  ;;  %v161_v6 = vld [vmem:[%s286_s3] sm:$0xff]  ;;  %s226_s3 = smov [#allocation5]  }
   0x9   :  { %111 = vmatpush.bf16.msra.mxu1 %v162_v5  ;;  %v169_v8 = vld [vmem:[%s285_s2] ss:$0 sm:$0xff]  ;;  %s126_s10 = sshll.u32 %s226_s3, 4  ;;  %s128_s2 = sshll.u32 %s288_s5, 4  ;;  %s127_s10 = int_to_ptr.vmem [resolvable:$true] %s126_s10  ;;  %s129_s2 = int_to_ptr.hbm [resolvable:$true] %s128_s2 }
   0xa   :  { %v170_v15 = vld [vmem:[%s287_s4] ss:$0 sm:$0xff] }
   0xb   :  { %72 = vmatpush.bf16.msra.mxu0 %v159_v1 }
   0xd   :  { %112 = vmatpush.bf16.msra.mxu1 %v161_v6 }
   0xe   :  { %149 = vmatmul.msk.bf16.vlgmr.msra.gmra.mxu0 %vm61_vm0, %v40_v4 }
  0x8b   :  { %v74_v7 = vpop.f32.mrf.mxu0 }
  0x8c   :  { %v75_v9 = vadd.f32 %v169_v8, %v74_v7 }
  0x8e   :  { %v79_v12 = vmax.f32 %v75_v9, 0.0 }
  0x93   :  { %v76_v10 = vpop.f32.mrf.mxu0 }
  0x94   :  { %v77_v11 = vadd.f32 %v169_v8, %v76_v10 }
  0x96   :  { %v80_v13 = vmax.f32 %v77_v11, 0.0 }
  0x98   :  { %v81_v14 = vpack.c.bf16 %v80_v13, %v79_v12 }
  0x9a   :  { %158 = vmatmul.msk.bf16.vlgmr.msra.gmra.mxu1 %vm61_vm0, %v81_v14 }
 0x117   :  { %v114_v16 = vpop.f32.mrf.mxu1 }
 0x118   :  { %v115_v17 = vadd.f32 %v170_v15, %v114_v16 }
 0x11a   :  { %120 = vst.msk [vmem:[#allocation5] sm:$0xff] %vm119_vm1, %v115_v17 }
 0x11f   :  { %v116_v18 = vpop.f32.mrf.mxu1 }
 0x120   :  { %v117_v19 = vadd.f32 %v170_v15, %v116_v18 }
 0x122   :  { %121 = vst.msk [vmem:[#allocation5 + $0x8] sm:$0xff] %vm119_vm1, %v117_v19 }
 0x123   :  { %134 = dma.vmem_to_hbm [thread:$0]  %s127_s10, 256, %s129_s2, [#allocation4], %s227_s13, %s227_s13, %s228_s14  }
 0x124   :  { %221 = dma.done.wait [#allocation4], 256  }
 0x125   :  { %222 = vsyncadd [#allocation4], 4294967040 }
 0x126   :  { %139 = vsyncpa [#allocation3], 1 }
 0x127   :  { %140 = vsyncpa [#allocation4], 1 }

</bundles_post_ra>
